<compile_context>
chip_gen: v5e
topology: v5e:2x2
jax: 0.10.0
libtpu: 0.0.40
codegen_flags: <defaults>
</compile_context>

<pallas_src>
import jax
import jax.numpy as jnp
from jax.experimental import pallas as pl
from jax.experimental.pallas import tpu as pltpu


_TILE_BYTES = 4 * 1024 * 1024          # target per-block buffer size (~4 MiB)
_SMALL_BYTES = 1 * 1024 * 1024         # below this, use a single full-array block
_VMEM_LIMIT_BYTES = 32 * 1024 * 1024   # explicit scoped-VMEM limit (safe v5e/v6e/v7x)
_MIN_GRID_STEPS = 4                    # keep pipeline + v7x 2-TC sharding alive


def _arelu_kernel(params_ref, x_ref, o_ref):
    # params_ref lives in SMEM: [beta_eff, alpha_eff], already transformed in the
    # wrapper. Scalars are cast to the tile dtype so bf16 tiles stay bf16.
    x = x_ref[...]
    beta_eff = params_ref[0].astype(x.dtype)
    alpha_eff = params_ref[1].astype(x.dtype)
    zero = jnp.zeros((), x.dtype)
    out = jnp.maximum(x, zero) * beta_eff - jnp.maximum(-x, zero) * alpha_eff
    o_ref[...] = out.astype(o_ref.dtype)


def arelu(x, alpha, beta):
    """AReLU forward. x: NCHW float array. alpha, beta: shape (1,) float32 params."""
    orig_shape = x.shape
    dtype = x.dtype
    total = x.size
    itemsize = jnp.dtype(dtype).itemsize

    # Hoist the parameter transforms: run once per call, not once per grid step.
    alpha_eff = jnp.clip(alpha.reshape(-1)[0], 0.01, 0.99)
    beta_eff = 1.0 + jax.nn.sigmoid(beta.reshape(-1)[0])
    params = jnp.stack([beta_eff, alpha_eff]).astype(jnp.float32)

    flat = x.reshape(-1)

    # Pick a lane-dense column width (multiple of 128) that divides the element
    # count exactly -> zero padding, zero output slicing in the common case.
    cols = None
    for c in (1024, 512, 256, 128):
        if total % c == 0:
            cols = c
            break

    if cols is None:
        # Rare fallback (total not a multiple of 128): pad up to the lane width.
        # TODO(synk): this costs one extra pass over the data; only hit for odd sizes.
        cols = 1024 if total >= 1024 else 128
        padded_total = pl.cdiv(total, cols) * cols
        flat = jnp.pad(flat, (0, padded_total - total))
    else:
        padded_total = total

    rows = padded_total // cols
    x2d = flat.reshape(rows, cols)

    # Sublane multiple per dtype (f32: 8, bf16/f16: 16, int8/fp8: 32).
    sub = max(8, 32 // itemsize)

    if padded_total * itemsize <= _SMALL_BYTES or rows < sub:
        # Tiny input: one block equal to the full array dims (always layout-legal,
        # pipelining irrelevant at this size).
        tm = rows
        grid = (1,)
    else:
        # Largest tile that fits ~_TILE_BYTES while keeping >= _MIN_GRID_STEPS grid
        # steps; tm is a sublane multiple so the final partial block wastes < `sub`
        # rows (boundary blocks are auto-masked on writeback).
        tm_max = max(sub, (_TILE_BYTES // (cols * itemsize)) // sub * sub)
        n_steps = max(_MIN_GRID_STEPS, pl.cdiv(rows, tm_max))
        tm = min(tm_max, pl.cdiv(pl.cdiv(rows, n_steps), sub) * sub)
        grid = (pl.cdiv(rows, tm),)

    cost = pl.CostEstimate(
        flops=5 * padded_total,
        transcendentals=0,
        bytes_accessed=2 * padded_total * itemsize,
    )

    out2d = pl.pallas_call(
        _arelu_kernel,
        out_shape=jax.ShapeDtypeStruct((rows, cols), dtype),
        grid_spec=pltpu.PrefetchScalarGridSpec(
            num_scalar_prefetch=0,
            grid=grid,
            in_specs=[
                pl.BlockSpec(memory_space=pltpu.MemorySpace.SMEM),  # params (2,)
                pl.BlockSpec((tm, cols), lambda i: (i, 0)),         # x tile
            ],
            out_specs=pl.BlockSpec((tm, cols), lambda i: (i, 0)),
        ),
        compiler_params=pltpu.CompilerParams(
            dimension_semantics=("parallel",),
            vmem_limit_bytes=_VMEM_LIMIT_BYTES,
        ),
        cost_estimate=cost,
    )(params, x2d)

    out_flat = out2d.reshape(-1)
    if padded_total != total:
        out_flat = out_flat[:total]
    return out_flat.reshape(orig_shape)


def arelu_reference(x, alpha, beta):
    a = jnp.clip(alpha.reshape(-1)[0], 0.01, 0.99)
    b = 1.0 + jax.nn.sigmoid(beta.reshape(-1)[0])
    return jnp.maximum(x, 0.0) * b - jnp.maximum(-x, 0.0) * a


if __name__ == "__main__":
    key = jax.random.PRNGKey(0)
    x = jax.random.normal(key, (2, 4, 16, 16), dtype=jnp.float32)

    # Deterministic parameter init, matching nn.Parameter defaults in __init__.
    alpha = jnp.array([0.9], dtype=jnp.float32)
    beta = jnp.array([2.0], dtype=jnp.float32)

    out = jax.block_until_ready(arelu(x, alpha, beta))

    ref = arelu_reference(x, alpha, beta)
    assert out.shape == x.shape and out.dtype == x.dtype
    assert jnp.allclose(out, ref, atol=1e-6, rtol=1e-6), "mismatch vs reference"

    print("KERNEL_OK")
</pallas_src>

<mosaic_0001>
module attributes {stable_mosaic.version = 11 : i64} {
  func.func @_arelu_kernel(%arg0: i32, %arg1: memref<2xf32, #tpu.memory_space<smem>>, %arg2: memref<2x1024xf32, #tpu.memory_space<vmem>>, %arg3: memref<2x1024xf32, #tpu.memory_space<vmem>>) attributes {dimension_semantics = [#tpu.dimension_semantics<parallel>], iteration_bounds = array<i64: 1>, scalar_prefetch = 0 : i64, scratch_operands = 0 : i64, tpu.core_type = #tpu.core_type<tc>, window_params = [{transform_indices = @transform_0, window_bounds = array<i64: 2>}, {transform_indices = @transform_1, window_bounds = array<i64: 2, 1024>}, {transform_indices = @transform_2, window_bounds = array<i64: 2, 1024>}]} {
    %c0 = arith.constant 0 : index
    %c0_0 = arith.constant 0 : index
    %0 = vector.load %arg2[%c0, %c0_0] : memref<2x1024xf32, #tpu.memory_space<vmem>>, vector<2x1024xf32>
    %c0_1 = arith.constant 0 : index
    %1 = memref.load %arg1[%c0_1] : memref<2xf32, #tpu.memory_space<smem>>
    %c1 = arith.constant 1 : index
    %2 = memref.load %arg1[%c1] : memref<2xf32, #tpu.memory_space<smem>>
    %cst = arith.constant 0.000000e+00 : f32
    %3 = vector.broadcast %cst : f32 to vector<2x1024xf32>
    %4 = arith.maximumf %0, %3 : vector<2x1024xf32>
    %5 = vector.broadcast %1 : f32 to vector<2x1024xf32>
    %6 = arith.mulf %4, %5 : vector<2x1024xf32>
    %cst_2 = arith.constant 0.000000e+00 : f32
    %7 = vector.broadcast %cst_2 : f32 to vector<2x1024xf32>
    %8 = arith.subf %7, %0 : vector<2x1024xf32>
    %cst_3 = arith.constant 0.000000e+00 : f32
    %9 = vector.broadcast %cst_3 : f32 to vector<2x1024xf32>
    %10 = arith.maximumf %8, %9 : vector<2x1024xf32>
    %11 = vector.broadcast %2 : f32 to vector<2x1024xf32>
    %12 = arith.mulf %10, %11 : vector<2x1024xf32>
    %13 = arith.subf %6, %12 : vector<2x1024xf32>
    %c0_4 = arith.constant 0 : index
    %c0_5 = arith.constant 0 : index
    %14 = vector.load %arg3[%c0_4, %c0_5] : memref<2x1024xf32, #tpu.memory_space<vmem>>, vector<2x1024xf32>
    tpu.vector_store %arg3[%c0_4, %c0_5], %13 {strides = array<i32>} : memref<2x1024xf32, #tpu.memory_space<vmem>>, vector<2x1024xf32>,
    return
  }
  func.func @transform_0(%arg0: i32) -> i32 {
    %c0_i32 = arith.constant 0 : i32
    %c0_i32_0 = arith.constant 0 : i32
    return %c0_i32 : i32
  }
  func.func @transform_1(%arg0: i32) -> (i32, i32) {
    %c0_i32 = arith.constant 0 : i32
    %c0_i32_0 = arith.constant 0 : i32
    return %arg0, %c0_i32 : i32, i32
  }
  func.func @transform_2(%arg0: i32) -> (i32, i32) {
    %c0_i32 = arith.constant 0 : i32
    %c0_i32_0 = arith.constant 0 : i32
    return %arg0, %c0_i32 : i32, i32
  }
}

</mosaic_0001>

<bundles_post_ra>
// kernel: tpu_custom_call.1
= control target key start
LH: loop header
LB: loop body
LE: loop exit
PB: predicated region body
PF: predicated region fallthrough
CT: control target
= control target key end

     0   :  { %7 = vsyncpa [#allocation5], 0  ;;  %s174_s0 = inlined_call_operand.hbm [shape: f32[2], index: 0, kind: input, shape index: {}]   ;;  %s175_s1 = inlined_call_operand.hbm [shape: f32[2,1024], index: 1, kind: input, shape index: {}]   ;;  %s176_s2 = inlined_call_operand.hbm [shape: f32[2,1024], index: 2, kind: output, shape index: {}]  }
   0x1   :  { %8 = vsyncpa [#allocation3], 0 }
   0x2   :  { %9 = vsyncpa [#allocation4], 0  ;;  %s15_s11 = sshll.u32 %s174_s0, 4  ;;  %s24_s14 = sshll.u32 %s175_s1, 4  ;;  %s16_s11 = int_to_ptr.hbm [resolvable:$true] %s15_s11  ;;  %s25_s14 = int_to_ptr.hbm [resolvable:$true] %s24_s14 }
   0x3   :  { %s147_s15 = smov [#allocation2]   ;;  %s148_s16 = smov [#allocation6]  }
   0x4   :  { %18 = dma.hbm_to_smem %s16_s11, 16, %s147_s15, [#allocation5]  }
   0x5   :  { %s26_s17 = sshll.u32 %s148_s16, 4  ;;  %s27_s17 = int_to_ptr.vmem [resolvable:$true] %s26_s17 }
   0x6   :  { %29 = dma.hbm_to_vmem [thread:$0]  %s25_s14, 256, %s27_s17, [#allocation3]  }
   0x7   :  { %141 = dma.done.wait [#allocation5], 16  }
   0x8   :  { %142 = vsyncadd [#allocation5], 4294967280 }
   0x9   :  { %143 = dma.done.wait [#allocation3], 256  }
   0xa   :  { %144 = vsyncadd [#allocation3], 4294967040 }
   0xb   :  { %38 = sfence }
   0xc   :  { %v39_v0 = vld [vmem:[#allocation6] sm:$0xff]  ;;  %s41_s18 = sld [smem:[#allocation2]]  ;;  %v40_v1 = vld [vmem:[#allocation6 + $0x8] sm:$0xff]  ;;  %s149_s1 = smov [#allocation7]  }
   0xd   :  { %s77_s0 = sld [smem:[#allocation2 + $0x1]]  ;;  %v48_v2 = vsub.f32 0.0, %v39_v0  ;;  %v49_v3 = vsub.f32 0.0, %v40_v1  ;;  %v43_v4 = vmax.f32 %v39_v0, 0.0  ;;  %v44_v5 = vmax.f32 %v40_v1, 0.0  ;;  %s64_s19 = sshll.u32 %s149_s1, 4  ;;  %s65_s19 = int_to_ptr.vmem [resolvable:$true] %s64_s19 }
   0xe   :  { %s66_s22 = sshll.u32 %s176_s2, 4  ;;  %s67_s22 = int_to_ptr.hbm [resolvable:$true] %s66_s22 }
   0xf   :  { %v50_v6 = vmax.f32 %v48_v2, 0.0  ;;  %v51_v7 = vmax.f32 %v49_v3, 0.0 }
  0x12   :  { %v45_v8 = vstv %s41_s18 }
  0x13   :  { %v46_v9 = vmul.f32 %v45_v8, %v43_v4  ;;  %v52_v10 = vstv %s77_s0  ;;  %v47_v11 = vmul.f32 %v45_v8, %v44_v5 }
  0x14   :  { %v53_v12 = vmul.f32 %v52_v10, %v50_v6  ;;  %v54_v13 = vmul.f32 %v52_v10, %v51_v7 }
  0x16   :  { %v55_v14 = vsub.f32 %v46_v9, %v53_v12  ;;  %v56_v15 = vsub.f32 %v47_v11, %v54_v13 }
  0x18   :  { %57 = vst [vmem:[#allocation7] sm:$0xff] %v55_v14 }
  0x19   :  { %58 = vst [vmem:[#allocation7 + $0x8] sm:$0xff] %v56_v15 }
  0x1a   :  { %69 = dma.vmem_to_hbm [thread:$0]  %s65_s19, 256, %s67_s22, [#allocation4]  }
  0x1b   :  { %145 = dma.done.wait [#allocation4], 256  }
  0x1c   :  { %146 = vsyncadd [#allocation4], 4294967040 }
  0x1d   :  { %74 = vsyncpa [#allocation3], 1 }
  0x1e   :  { %75 = vsyncpa [#allocation4], 1 }
  0x1f   :  { %76 = vsyncpa [#allocation5], 1 }

</bundles_post_ra>
